<compile_context>
chip_gen: v7x
topology: tpu7x:2x2x1
jax: 0.10.0
libtpu: 0.0.40
codegen_flags: <defaults>
</compile_context>

<pallas_src>
import functools

import jax
import jax.numpy as jnp
from jax.experimental import pallas as pl
from jax.experimental.pallas import tpu as pltpu


_TEMP = 3.0
_EPS = 1e-7


def _round_up(x, m):
    return (x + m - 1) // m * m


def _kldiv_kernel(pred_ref, label_ref, out_ref, *, n_valid, tm):
    """One row-tile: per-row KL contribution, padded rows zeroed."""
    i = pl.program_id(0)
    inv_t = 1.0 / _TEMP

    p = pred_ref[...].astype(jnp.float32) * inv_t      # (TM, C)
    l = label_ref[...].astype(jnp.float32) * inv_t     # (TM, C)

    # predict = log_softmax(pred / T, axis=1)  (numerically stable)
    p_max = jnp.max(p, axis=1, keepdims=True)
    p_shift = p - p_max
    log_z_p = jnp.log(jnp.sum(jnp.exp(p_shift), axis=1, keepdims=True))
    log_pred = p_shift - log_z_p                        # (TM, C)

    # target = softmax(label / T, axis=1) + 1e-7
    l_max = jnp.max(l, axis=1, keepdims=True)
    e_l = jnp.exp(l - l_max)
    z_l = jnp.sum(e_l, axis=1, keepdims=True)
    tgt = e_l / z_l + _EPS                              # (TM, C)

    # per-row contribution: sum_c target * (log(target) - predict)
    row_kl = jnp.sum(tgt * (jnp.log(tgt) - log_pred), axis=1, keepdims=True)

    # zero out rows added by batch padding so the XLA-side sum is exact
    row_idx = i * tm + jax.lax.broadcasted_iota(jnp.int32, (tm, 1), 0)
    out_ref[...] = jnp.where(row_idx < n_valid, row_kl, 0.0)


def kldiv_loss(pred, label, *, tm=None):
    """Pallas TPU forward of the PyTorch KLDivLoss module (returns scalar)."""
    assert pred.shape == label.shape and pred.ndim == 2
    n, c = pred.shape

    # Row tile: multiple of 8 (sublane), sized so ~8 live (TM, C) f32
    # temporaries plus double-buffered inputs stay within a few MiB of VMEM
    # (safe on v5e/v6e and on v7x's smaller 64 MiB VMEM).
    if tm is None:
        budget_rows = max(8, (4 * 1024 * 1024) // (32 * max(c, 1)))
        tm = min(512, _round_up(min(n, budget_rows), 8))
    tm = max(8, _round_up(tm, 8))
    n_pad = _round_up(n, tm)

    if n_pad != n:
        pad = ((0, n_pad - n), (0, 0))
        pred = jnp.pad(pred, pad)
        label = jnp.pad(label, pad)

    kernel = functools.partial(_kldiv_kernel, n_valid=n, tm=tm)

    per_row = pl.pallas_call(
        kernel,
        out_shape=jax.ShapeDtypeStruct((n_pad, 1), jnp.float32),
        grid=(n_pad // tm,),
        in_specs=[
            pl.BlockSpec((tm, c), lambda i: (i, 0)),
            pl.BlockSpec((tm, c), lambda i: (i, 0)),
        ],
        out_specs=pl.BlockSpec((tm, 1), lambda i: (i, 0)),
        compiler_params=pltpu.CompilerParams(
            dimension_semantics=("parallel",),
            vmem_limit_bytes=32 * 1024 * 1024,
        ),
    )(pred, label)

    # Tiny final reduction + scaling in XLA: T^2 * total_sum / batch_size.
    return (_TEMP * _TEMP) * jnp.sum(per_row) / n


def _kldiv_reference(pred, label):
    predict = jax.nn.log_softmax(pred / _TEMP, axis=1)
    target = jax.nn.softmax(label / _TEMP, axis=1) + _EPS
    return (_TEMP * _TEMP) * jnp.sum(
        target * (jnp.log(target) - predict)) / pred.shape[0]


if __name__ == "__main__":
    key = jax.random.PRNGKey(0)
    k_p, k_l = jax.random.split(key)

    # Small shapes consistent with the module: batch=8 rows, 32 classes.
    N, C = 8, 32
    pred = jax.random.normal(k_p, (N, C), dtype=jnp.float32)
    label = jax.random.normal(k_l, (N, C), dtype=jnp.float32)

    # TODO(synk): the .cuda()/Variable detach in the reference is device /
    # autograd plumbing with no forward-pass effect; not translated.
    loss = kldiv_loss(pred, label)
    jax.block_until_ready(loss)

    ref = _kldiv_reference(pred, label)
    assert jnp.allclose(loss, ref, rtol=1e-4, atol=1e-5), (loss, ref)
    print("KERNEL_OK")
</pallas_src>

<mosaic_0001>
module attributes {stable_mosaic.version = 11 : i64} {
  func.func @_kldiv_kernel(%arg0: i32, %arg1: memref<8x32xf32, #tpu.memory_space<vmem>>, %arg2: memref<8x32xf32, #tpu.memory_space<vmem>>, %arg3: memref<8x1xf32, #tpu.memory_space<vmem>>) attributes {dimension_semantics = [#tpu.dimension_semantics<parallel>], iteration_bounds = array<i64: 1>, scalar_prefetch = 0 : i64, scratch_operands = 0 : i64, tpu.core_type = #tpu.core_type<tc>, window_params = [{transform_indices = @transform_0, window_bounds = array<i64: 8, 32>}, {transform_indices = @transform_1, window_bounds = array<i64: 8, 32>}, {transform_indices = @transform_2, window_bounds = array<i64: 8, 1>}]} {
    %c0 = arith.constant 0 : index
    %c0_0 = arith.constant 0 : index
    %0 = vector.load %arg1[%c0, %c0_0] : memref<8x32xf32, #tpu.memory_space<vmem>>, vector<8x32xf32>
    %cst = arith.constant 0.333333343 : f32
    %1 = vector.broadcast %cst : f32 to vector<8x32xf32>
    %2 = arith.mulf %0, %1 : vector<8x32xf32>
    %c0_1 = arith.constant 0 : index
    %c0_2 = arith.constant 0 : index
    %3 = vector.load %arg2[%c0_1, %c0_2] : memref<8x32xf32, #tpu.memory_space<vmem>>, vector<8x32xf32>
    %cst_3 = arith.constant 0.333333343 : f32
    %4 = vector.broadcast %cst_3 : f32 to vector<8x32xf32>
    %5 = arith.mulf %3, %4 : vector<8x32xf32>
    %cst_4 = arith.constant dense<0xFF800000> : vector<8xf32>
    %6 = vector.multi_reduction <maximumf>, %2, %cst_4 [1] : vector<8x32xf32> to vector<8xf32>
    %7 = vector.shape_cast %6 : vector<8xf32> to vector<8x1xf32>
    %8 = vector.broadcast %7 : vector<8x1xf32> to vector<8x32xf32>
    %9 = arith.subf %2, %8 : vector<8x32xf32>
    %10 = math.exp %9 : vector<8x32xf32>
    %cst_5 = arith.constant dense<0.000000e+00> : vector<8xf32>
    %11 = vector.multi_reduction <add>, %10, %cst_5 [1] : vector<8x32xf32> to vector<8xf32>
    %12 = vector.shape_cast %11 : vector<8xf32> to vector<8x1xf32>
    %13 = math.log %12 : vector<8x1xf32>
    %14 = vector.broadcast %13 : vector<8x1xf32> to vector<8x32xf32>
    %15 = arith.subf %9, %14 : vector<8x32xf32>
    %cst_6 = arith.constant dense<0xFF800000> : vector<8xf32>
    %16 = vector.multi_reduction <maximumf>, %5, %cst_6 [1] : vector<8x32xf32> to vector<8xf32>
    %17 = vector.shape_cast %16 : vector<8xf32> to vector<8x1xf32>
    %18 = vector.broadcast %17 : vector<8x1xf32> to vector<8x32xf32>
    %19 = arith.subf %5, %18 : vector<8x32xf32>
    %20 = math.exp %19 : vector<8x32xf32>
    %cst_7 = arith.constant dense<0.000000e+00> : vector<8xf32>
    %21 = vector.multi_reduction <add>, %20, %cst_7 [1] : vector<8x32xf32> to vector<8xf32>
    %22 = vector.shape_cast %21 : vector<8xf32> to vector<8x1xf32>
    %23 = vector.broadcast %22 : vector<8x1xf32> to vector<8x32xf32>
    %24 = arith.divf %20, %23 : vector<8x32xf32>
    %cst_8 = arith.constant 1.000000e-07 : f32
    %25 = vector.broadcast %cst_8 : f32 to vector<8x32xf32>
    %26 = arith.addf %24, %25 : vector<8x32xf32>
    %27 = math.log %26 : vector<8x32xf32>
    %28 = arith.subf %27, %15 : vector<8x32xf32>
    %29 = arith.mulf %26, %28 : vector<8x32xf32>
    %cst_9 = arith.constant dense<0.000000e+00> : vector<8xf32>
    %30 = vector.multi_reduction <add>, %29, %cst_9 [1] : vector<8x32xf32> to vector<8xf32>
    %31 = vector.shape_cast %30 : vector<8xf32> to vector<8x1xf32>
    %c8_i32 = arith.constant 8 : i32
    %32 = arith.muli %arg0, %c8_i32 : i32
    %33 = tpu.iota {dimensions = array<i32: 0>} : vector<8x1xi32>
    %34 = vector.broadcast %32 : i32 to vector<8x1xi32>
    %35 = arith.addi %34, %33 : vector<8x1xi32>
    %c8_i32_10 = arith.constant 8 : i32
    %36 = vector.broadcast %c8_i32_10 : i32 to vector<8x1xi32>
    %37 = arith.cmpi slt, %35, %36 : vector<8x1xi32>
    %cst_11 = arith.constant 0.000000e+00 : f32
    %38 = vector.broadcast %cst_11 : f32 to vector<8x1xf32>
    %39 = arith.select %37, %31, %38 : vector<8x1xi1>, vector<8x1xf32>
    %c0_12 = arith.constant 0 : index
    %c0_13 = arith.constant 0 : index
    %40 = vector.load %arg3[%c0_12, %c0_13] : memref<8x1xf32, #tpu.memory_space<vmem>>, vector<8x1xf32>
    tpu.vector_store %arg3[%c0_12, %c0_13], %39 {strides = array<i32>} : memref<8x1xf32, #tpu.memory_space<vmem>>, vector<8x1xf32>,
    return
  }
  func.func @transform_0(%arg0: i32) -> (i32, i32) {
    %c0_i32 = arith.constant 0 : i32
    %c0_i32_0 = arith.constant 0 : i32
    return %arg0, %c0_i32 : i32, i32
  }
  func.func @transform_1(%arg0: i32) -> (i32, i32) {
    %c0_i32 = arith.constant 0 : i32
    %c0_i32_0 = arith.constant 0 : i32
    return %arg0, %c0_i32 : i32, i32
  }
  func.func @transform_2(%arg0: i32) -> (i32, i32) {
    %c0_i32 = arith.constant 0 : i32
    %c0_i32_0 = arith.constant 0 : i32
    return %arg0, %c0_i32 : i32, i32
  }
}

</mosaic_0001>

<bundles_post_ra>
// kernel: tpu_custom_call.1
= control target key start
LH: loop header
LB: loop body
LE: loop exit
PB: predicated region body
PF: predicated region fallthrough
CT: control target
= control target key end

     0   :  { %7 = vsyncpa [#allocation3], 0  ;;  %s195_s0 = inlined_call_operand.hbm [shape: f32[8,32], index: 0, kind: input, shape index: {}]   ;;  %s196_s1 = inlined_call_operand.hbm [shape: f32[8,32], index: 1, kind: input, shape index: {}]   ;;  %s197_s2 = inlined_call_operand.vmem [shape: f32[8,1], index: 2, kind: output, shape index: {}]  }
   0x1   :  { %8 = vsyncpa [#allocation5], 0  ;;  %s146_s9 = smov [#allocation2]   ;;  %s147_s11 = smov [#allocation4]  }
   0x2   :  { %s15_s10 = sshll.u32 %s146_s9, 4  ;;  %s25_s12 = sshll.u32 %s147_s11, 4  ;;  %s16_s10 = int_to_ptr.vmem [resolvable:$true] %s15_s10  ;;  %s26_s12 = int_to_ptr.vmem [resolvable:$true] %s25_s12 }
   0x3   :  { %s98_s15 = scalar_lea.hbm %s195_s0, 128 }
   0x4   :  { %p99_p0 = scmp.ne.s32.totalorder %s195_s0, %s98_s15  ;;  %p102_p1 = scmp.lt.u32.totalorder %s98_s15, %s195_s0 }
   0x6   :  { %p104_p2 = pnand %p102_p1, %p99_p0 }
   0x8   :  { %107 = shalt.err (!%p104_p2)
}
   0x9   :  { %s108_s20 = scalar_lea.vmem %s16_s10, 128  ;;  %p113_p4 = scmp.lt.s32.totalorder %s16_s10, %s16_s10 }
   0xa   :  { %p109_p3 = scmp.ne.s32.totalorder %s16_s10, %s108_s20  ;;  %p114_p5 = scmp.lt.s32.totalorder %s108_s20, %s108_s20 }
   0xc   :  { %p115_p6 = por %p114_p5, %p113_p4 }
   0xe   :  { %p116_p7 = pnand %p115_p6, %p109_p3 }
  0x10   :  { %119 = shalt.err (!%p116_p7)
}
  0x11   :  { %18 = dma.hbm_to_vmem [thread:$0]  %s195_s0, 128, %s16_s10, [#allocation3]  }
  0x12   :  { %s120_s25 = scalar_lea.hbm %s196_s1, 128 }
  0x13   :  { %p121_p8 = scmp.ne.s32.totalorder %s196_s1, %s120_s25  ;;  %p124_p9 = scmp.lt.u32.totalorder %s120_s25, %s196_s1 }
  0x15   :  { %p126_p10 = pnand %p124_p9, %p121_p8 }
  0x17   :  { %129 = shalt.err (!%p126_p10)
}
  0x18   :  { %s130_s30 = scalar_lea.vmem %s26_s12, 128  ;;  %p135_p12 = scmp.lt.s32.totalorder %s26_s12, %s26_s12 }
  0x19   :  { %p131_p11 = scmp.ne.s32.totalorder %s26_s12, %s130_s30  ;;  %p136_p13 = scmp.lt.s32.totalorder %s130_s30, %s130_s30 }
  0x1b   :  { %p137_p0 = por %p136_p13, %p135_p12 }
  0x1d   :  { %p138_p1 = pnand %p137_p0, %p131_p11 }
  0x1f   :  { %141 = shalt.err (!%p138_p1)
}
  0x20   :  { %28 = dma.hbm_to_vmem [thread:$0]  %s196_s1, 128, %s26_s12, [#allocation5]  }
  0x21   :  { %142 = dma.done.wait [#allocation3], 128  }
  0x22   :  { %143 = vsyncadd [#allocation3], 4294967168 }
  0x23   :  { %144 = dma.done.wait [#allocation5], 128  }
  0x24   :  { %145 = vsyncadd [#allocation5], 4294967168  ;;  %v37_v0 = vld [vmem:[#allocation4] sm:$0xff]  ;;  %vm39_vm0 = vcmask 261120   ;;  %v35_v1 = vld [vmem:[#allocation2] sm:$0xff]  ;;  %vm78_vm1 = vcmask 7168  }
  0x25   :  { %v38_v2 = vmul.f32 0.33333334, %v37_v0  ;;  %v36_v3 = vmul.f32 0.33333334, %v35_v1 }
  0x27   :  { %v52_v4 = vsel %vm39_vm0, %v38_v2, -inf  ;;  %v40_v5 = vsel %vm39_vm0, %v36_v3, -inf }
  0x28   :  { %53 = vmax.xlane.f32.xlu0 %v52_v4 }
  0x2c   :  { %41 = vmax.xlane.f32.xlu0 %v40_v5 }
  0xb5   :  { %v54_v6 = vpop.xlane.xlu0 %53 }
  0xb6   :  { %v55_v7 = vsub.f32 %v38_v2, %v54_v6 }
  0xb8   :  { %v56_v8 = vmul.f32 1.442695, %v55_v7 }
  0xb9   :  { %v42_v9 = vpop.xlane.xlu0 %41 }
  0xba   :  { %88 = vpow2.f32 %v56_v8  ;;  %v43_v10 = vsub.f32 %v36_v3, %v42_v9 }
  0xbc   :  { %v44_v11 = vmul.f32 1.442695, %v43_v10 }
  0xbe   :  { %90 = vpow2.f32 %v44_v11 }
  0xc4   :  { %v89_v12 = vpop.eup %88 }
  0xc5   :  { %v58_v13 = vsel %vm39_vm0, %v89_v12, 0.0 }
  0xc6   :  { %59 = vadd.xlane.f32.xlu1 %v58_v13 }
  0xc8   :  { %v91_v14 = vpop.eup %90 }
  0xc9   :  { %v46_v15 = vsel %vm39_vm0, %v91_v14, 0.0 }
  0xca   :  { %47 = vadd.xlane.f32.xlu1 %v46_v15 }
 0x153   :  { %v60_v16 = vpop.xlane.xlu1 %59 }
 0x154   :  { %92 = vrcp.f32 %v60_v16 }
 0x157   :  { %v48_v17 = vpop.xlane.xlu1 %47 }
 0x158   :  { %94 = vlog2.f32 %v48_v17 }
 0x15e   :  { %v93_v18 = vpop.eup %92 }
 0x15f   :  { %v62_v19 = vmul.f32 %v93_v18, %v89_v12 }
 0x161   :  { %v63_v20 = vadd.f32 1e-07, %v62_v19 }
 0x162   :  { %v95_v21 = vpop.eup %94 }
 0x163   :  { %96 = vlog2.f32 %v63_v20  ;;  %v50_v22 = vmul.f32 0.6931472, %v95_v21 }
 0x165   :  { %v51_v24 = vsub.f32 %v43_v10, %v50_v22 }
 0x16d   :  { %v97_v23 = vpop.eup %96 }
 0x16e   :  { %v65_v25 = vmul.f32 0.6931472, %v97_v23 }
 0x170   :  { %v66_v26 = vsub.f32 %v65_v25, %v51_v24 }
 0x172   :  { %v67_v27 = vmul.f32 %v66_v26, %v63_v20 }
 0x174   :  { %v68_v28 = vsel %vm39_vm0, %v67_v27, 0.0 }
 0x175   :  { %69 = vadd.xlane.f32.xlu0 %v68_v28 }
 0x202   :  { %v70_v29 = vpop.xlane.xlu0 %69 }
 0x203   :  { %79 = vst.msk [vmem:[%s197_s2] sm:$0xff] %vm78_vm1, %v70_v29 }
 0x204   :  { %84 = vsyncpa [#allocation3], 1 }
 0x205   :  { %85 = vsyncpa [#allocation5], 1 }

</bundles_post_ra>
